<compile_context>
chip_gen: v6e
topology: v6e:2x2x1
jax: 0.10.0
libtpu: 0.0.40
codegen_flags: <defaults>
</compile_context>

<pallas_src>
import jax
import jax.numpy as jnp
from jax.experimental import pallas as pl
from jax.experimental.pallas import tpu as pltpu

_LANES = 128          # TPU lane width (fast axis of a vreg).
_SUBLANES = 8         # f32 sublane count of one (8,128) vreg / tile.
_MAX_TILE_ROWS = 512  # rows per grid step for the batched path (512*128*4 B = 256 KiB/tile).


# ----------------------------------------------------------------------------------
# Kernels
# ----------------------------------------------------------------------------------
def _qexp_tiled_kernel(t0_ref, t1_ref, out_ref):
    """<Z> = -sin(t0) * cos(t1), elementwise on a sublane-dense (TR, 128) tile."""
    out_ref[...] = -(jnp.sin(t0_ref[...]) * jnp.cos(t1_ref[...]))


def _qexp_scalar_kernel(thetas_ref, out_ref):
    """Single-circuit forward.  thetas (2,) f32 in SMEM -> (1,128) f32 row (lane 0 used)."""
    t0 = jnp.full((1, _LANES), thetas_ref[0], jnp.float32)   # scalar -> vreg broadcast
    t1 = jnp.full((1, _LANES), thetas_ref[1], jnp.float32)
    out_ref[...] = -(jnp.sin(t0) * jnp.cos(t1))


def _pshift_fused_kernel(thetas_ref, shift_ref, out_ref):
    """Fused base + 4 parameter-shift evaluations + gradient reduction.

    thetas_ref : (2,) f32 SMEM     shift_ref : (1,) f32 SMEM
    out_ref    : (1,128) f32 VMEM  lane0 = <Z>(thetas), lane1 = dE/dt0, lane2 = dE/dt1.
    Lanes 0..4 of the working row hold (base, t0+s, t0-s, t1+s, t1-s), so the two
    sin/cos EUP vector ops cover all 5 circuit evaluations at once.
    """
    lane = jax.lax.broadcasted_iota(jnp.int32, (1, _LANES), 1)
    t0 = jnp.full((1, _LANES), thetas_ref[0], jnp.float32)
    t1 = jnp.full((1, _LANES), thetas_ref[1], jnp.float32)
    s = jnp.full((1, _LANES), shift_ref[0], jnp.float32)
    zero = jnp.zeros((1, _LANES), jnp.float32)

    d0 = jnp.where(lane == 1, s, zero) - jnp.where(lane == 2, s, zero)
    d1 = jnp.where(lane == 3, s, zero) - jnp.where(lane == 4, s, zero)
    e = -(jnp.sin(t0 + d0) * jnp.cos(t1 + d1))                       # (1, 128)

    w_e = (lane == 0).astype(jnp.float32)
    # Fixed 0.5 factor matches QuantumFunction.backward (exact gradient for shift = pi/2).
    w_g0 = 0.5 * ((lane == 1).astype(jnp.float32) - (lane == 2).astype(jnp.float32))
    w_g1 = 0.5 * ((lane == 3).astype(jnp.float32) - (lane == 4).astype(jnp.float32))

    e_base = jnp.sum(e * w_e, axis=-1, keepdims=True)                # (1,1) XLU reduce
    g0 = jnp.sum(e * w_g0, axis=-1, keepdims=True)
    g1 = jnp.sum(e * w_g1, axis=-1, keepdims=True)
    out_ref[...] = (jnp.where(lane == 0, e_base, zero)
                    + jnp.where(lane == 1, g0, zero)
                    + jnp.where(lane == 2, g1, zero))


# ----------------------------------------------------------------------------------
# Wrappers
# ----------------------------------------------------------------------------------
def _batched_layout(b: int):
    """Static layout math: batch size -> (total padded rows, rows per grid step)."""
    rows = -(-b // _LANES)
    rows = max(_SUBLANES, -(-rows // _SUBLANES) * _SUBLANES)     # multiple of 8, >= 8
    tile_rows = min(_MAX_TILE_ROWS, rows)
    total_rows = -(-rows // tile_rows) * tile_rows               # multiple of tile_rows
    return total_rows, tile_rows


@jax.jit
def quantum_expectations(theta_pairs: jax.Array) -> jax.Array:
    """Batched circuit evaluation: (B, 2) angle pairs -> (B,) expectations."""
    theta_pairs = jnp.asarray(theta_pairs, jnp.float32)
    b = theta_pairs.shape[0]
    total_rows, tile_rows = _batched_layout(b)
    n = total_rows * _LANES
    # Layout glue (fused under jit): separate sublane-dense (R, 128) slabs per angle.
    t0 = jnp.zeros((n,), jnp.float32).at[:b].set(theta_pairs[:, 0]).reshape(total_rows, _LANES)
    t1 = jnp.zeros((n,), jnp.float32).at[:b].set(theta_pairs[:, 1]).reshape(total_rows, _LANES)

    out = pl.pallas_call(
        _qexp_tiled_kernel,
        out_shape=jax.ShapeDtypeStruct((total_rows, _LANES), jnp.float32),
        grid=(total_rows // tile_rows,),
        in_specs=[pl.BlockSpec((tile_rows, _LANES), lambda i: (i, 0)),
                  pl.BlockSpec((tile_rows, _LANES), lambda i: (i, 0))],
        out_specs=pl.BlockSpec((tile_rows, _LANES), lambda i: (i, 0)),
        compiler_params=pltpu.CompilerParams(dimension_semantics=("parallel",)),
    )(t0, t1)
    # Padding lanes hold -sin(0)*cos(0) = 0 and are sliced off.
    return out.reshape(-1)[:b]


@jax.jit
def quantum_layer_forward(thetas: jax.Array) -> jax.Array:
    """Pallas equivalent of QuantumLayer.forward(input) -> 0-d f32 expectation."""
    thetas = jnp.asarray(thetas, jnp.float32).reshape(-1)[:2]
    out = pl.pallas_call(
        _qexp_scalar_kernel,
        out_shape=jax.ShapeDtypeStruct((1, _LANES), jnp.float32),
        in_specs=[pl.BlockSpec(memory_space=pltpu.MemorySpace.SMEM)],
        out_specs=pl.BlockSpec(memory_space=pltpu.MemorySpace.VMEM),
    )(thetas)
    return out[0, 0]


@jax.jit
def parameter_shift_forward_and_grads(thetas, shift):
    """Fused training-step helper: forward expectation + parameter-shift gradients.
    Pair construction, the 5 circuit evaluations and the gradient reduction all run
    inside ONE pallas_call (no XLA glue HLOs on the hot path)."""
    thetas = jnp.asarray(thetas, jnp.float32).reshape(-1)[:2]
    shift = jnp.asarray(shift, jnp.float32).reshape(1)
    out = pl.pallas_call(
        _pshift_fused_kernel,
        out_shape=jax.ShapeDtypeStruct((1, _LANES), jnp.float32),
        in_specs=[pl.BlockSpec(memory_space=pltpu.MemorySpace.SMEM),
                  pl.BlockSpec(memory_space=pltpu.MemorySpace.SMEM)],
        out_specs=pl.BlockSpec(memory_space=pltpu.MemorySpace.VMEM),
    )(thetas, shift)
    return out[0, 0], out[0, 1:3]


# ----------------------------------------------------------------------------------
# Self-test
# ----------------------------------------------------------------------------------
if __name__ == "__main__":
    key = jax.random.PRNGKey(0)
    thetas = jax.random.uniform(key, (2,), dtype=jnp.float32,
                                minval=-jnp.pi, maxval=jnp.pi)
    shift = jnp.float32(jnp.pi / 2.0)   # only used by the (fused) parameter-shift path

    # --- single forward pass (matches QuantumLayer.forward) ------------------------
    out = quantum_layer_forward(thetas)
    jax.block_until_ready(out)
    ref = (-jnp.sin(thetas[0]) * jnp.cos(thetas[1])).astype(jnp.float32)
    assert jnp.allclose(out, ref, atol=1e-5, rtol=1e-5), (out, ref)

    # --- fused base + parameter-shift evaluations (5 circuits, 1 kernel call) ------
    exp_base, grads = parameter_shift_forward_and_grads(thetas, shift)
    jax.block_until_ready((exp_base, grads))
    assert jnp.allclose(exp_base, ref, atol=1e-5, rtol=1e-5), (exp_base, ref)
    g_ref = jnp.stack([-jnp.cos(thetas[0]) * jnp.cos(thetas[1]),
                       jnp.sin(thetas[0]) * jnp.sin(thetas[1])])
    assert jnp.allclose(grads, g_ref, atol=1e-4, rtol=1e-4), (grads, g_ref)

    # --- batched, sublane-dense, tiled path (e.g. hyperparameter sweeps) -----------
    pairs = jax.random.uniform(jax.random.PRNGKey(1), (300, 2), dtype=jnp.float32,
                               minval=-jnp.pi, maxval=jnp.pi)
    exps = quantum_expectations(pairs)
    jax.block_until_ready(exps)
    exps_ref = -jnp.sin(pairs[:, 0]) * jnp.cos(pairs[:, 1])
    assert jnp.allclose(exps, exps_ref, atol=1e-5, rtol=1e-5), "batched mismatch"

    print("KERNEL_OK")
</pallas_src>

<mosaic_0001>
module attributes {stable_mosaic.version = 11 : i64} {
  func.func @_qexp_scalar_kernel(%arg0: memref<2xf32, #tpu.memory_space<smem>>, %arg1: memref<1x128xf32, #tpu.memory_space<vmem>>) attributes {dimension_semantics = [], scalar_prefetch = 0 : i64, scratch_operands = 0 : i64, tpu.core_type = #tpu.core_type<tc>} {
    %c0 = arith.constant 0 : index
    %0 = memref.load %arg0[%c0] : memref<2xf32, #tpu.memory_space<smem>>
    %1 = vector.broadcast %0 : f32 to vector<1x128xf32>
    %c1 = arith.constant 1 : index
    %2 = memref.load %arg0[%c1] : memref<2xf32, #tpu.memory_space<smem>>
    %3 = vector.broadcast %2 : f32 to vector<1x128xf32>
    %4 = math.sin %1 : vector<1x128xf32>
    %5 = math.cos %3 : vector<1x128xf32>
    %6 = arith.mulf %4, %5 : vector<1x128xf32>
    %cst = arith.constant 0.000000e+00 : f32
    %7 = vector.broadcast %cst : f32 to vector<1x128xf32>
    %8 = arith.subf %7, %6 : vector<1x128xf32>
    %c0_0 = arith.constant 0 : index
    %c0_1 = arith.constant 0 : index
    %9 = vector.load %arg1[%c0_0, %c0_1] : memref<1x128xf32, #tpu.memory_space<vmem>>, vector<1x128xf32>
    tpu.vector_store %arg1[%c0_0, %c0_1], %8 {strides = array<i32>} : memref<1x128xf32, #tpu.memory_space<vmem>>, vector<1x128xf32>,
    return
  }
}

</mosaic_0001>

<bundles_post_ra>
// kernel: quantum_layer_forward.1
= control target key start
LH: loop header
LB: loop body
LE: loop exit
PB: predicated region body
PF: predicated region fallthrough
CT: control target
= control target key end

     0   :  { %6 = vsyncpa [#allocation4], 0  ;;  %s424_s0 = inlined_call_operand.hbm [shape: f32[2], index: 0, kind: input, shape index: {}]   ;;  %s425_s1 = inlined_call_operand.hbm [shape: f32[1,128], index: 1, kind: output, shape index: {}]  }
   0x1   :  { %7 = vsyncpa [#allocation3], 0  ;;  %s314_s6 = smov [#allocation2]  }
   0x2   :  { %15 = dma.hbm_to_smem %s424_s0, 16, %s314_s6, [#allocation4]  }
   0x3   :  { %310 = dma.done.wait [#allocation4], 16  }
   0x4   :  { %311 = vsyncadd [#allocation4], 4294967280 }
   0x5   :  { %19 = sfence }
   0x6   :  { %s20_s9 = sld [smem:[#allocation2]]  ;;  %v315_v24 = vmov 683565275   ;;  %v316_v26 = vmov 2475754826   ;;  %s321_s0 = smov [#allocation5]  }
   0x7   :  { %s249_s10 = sld [smem:[#allocation2 + $0x1]]  ;;  %v317_v28 = vmov 2131351028   ;;  %v318_v30 = vmov 2102212464   ;;  %s240_s11 = sshll.u32 %s321_s0, 4  ;;  %s241_s11 = int_to_ptr.vmem [resolvable:$true] %s240_s11 }
   0x8   :  { %v319_v32 = vmov 920167782   ;;  %v320_v40 = vmov 1326507024   ;;  %s290_s12 = scalar_lea.vmem %s241_s11, 16  ;;  %s294_s13 = scalar_lea.vmem %s241_s11, 32 }
   0x9   :  { %p291_p0 = scmp.ne.s32.totalorder %s241_s11, %s290_s12  ;;  %p295_p1 = scmp.lt.s32.totalorder %s241_s11, %s241_s11 }
   0xa   :  { %p296_p2 = scmp.lt.s32.totalorder %s294_s13, %s290_s12 }
   0xc   :  { %v335_v0 = vstv %s20_s9  ;;  %p297_p3 = por %p296_p2, %p295_p1 }
   0xd   :  { %v337_v1 = vstv %s249_s10  ;;  %v24_v2 = vand.u32 2147483647, %v335_v0  ;;  %v27_v3 = vand.u32 2139095040, %v335_v0  ;;  %vm26_vm14 = vcmp.lt.s32.totalorder %v335_v0, 0 }
   0xe   :  { %v128_v4 = vand.u32 2147483647, %v337_v1  ;;  %v131_v5 = vand.u32 2139095040, %v337_v1  ;;  %p298_p4 = pnand %p297_p3, %p291_p0 }
   0xf   :  { %v28_v6 = vshrl.u32 %v27_v3, 23  ;;  %v31_v7 = vand.u32 8388607, %v24_v2  ;;  %vm398_vm15 = vcmp.le.f32.partialorder %v24_v2, 0.7853982 }
  0x10   :  { %v132_v8 = vshrl.u32 %v131_v5, 23  ;;  %v135_v9 = vand.u32 8388607, %v128_v4 }
  0x11   :  { %v250_v10 = vadd.s32 4294967169, %v28_v6  ;;  %v32_v13 = vor.u32 8388608, %v31_v7 }
  0x12   :  { %v254_v11 = vadd.s32 4294967169, %v132_v8  ;;  %v136_v14 = vor.u32 8388608, %v135_v9 }
  0x13   :  { %v34_v12 = vadd.s32 1, %v250_v10  ;;  %v347_v20 = vshll.u32 %v32_v13, 8 }
  0x14   :  { %v138_v15 = vadd.s32 1, %v254_v11  ;;  %v349_v22 = vshll.u32 %v136_v14, 8 }
  0x15   :  { %vm35_vm0 = vcmp.gt.s32.totalorder %v34_v12, 0 }
  0x16   :  { %v36_v16 = vsel %vm35_vm0, %v34_v12, 0  ;;  %vm139_vm1 = vcmp.gt.s32.totalorder %v138_v15, 0  ;;  %vm130_vm0 = vcmp.lt.s32.totalorder %v337_v1, 0 }
  0x17   :  { %v37_v17 = vshrl.u32 %v36_v16, 5  ;;  %v38_v18 = vand.u32 31, %v36_v16  ;;  %v140_v19 = vsel %vm139_vm1, %v138_v15, 0  ;;  %vm408_vm1 = vcmp.le.f32.partialorder %v128_v4, 0.7853982 }
  0x18   :  { %v142_v21 = vand.u32 31, %v140_v19  ;;  %v351_v34 = vshrl.u32 %v140_v19, 5 }
  0x19   :  { %v39_v23 = vsub.s32 32, %v38_v18  ;;  %v41_v25 = vshll.u32 %v315_v24, %v38_v18  ;;  %v44_v27 = vshll.u32 %v316_v26, %v38_v18  ;;  %v47_v29 = vshll.u32 %v317_v28, %v38_v18 }
  0x1a   :  { %v50_v31 = vshll.u32 %v318_v30, %v38_v18  ;;  %v53_v33 = vshll.u32 %v319_v32, %v38_v18  ;;  %vm56_vm2 = vcmp.lt.s32.totalorder %v37_v17, 1  ;;  %vm57_vm3 = vcmp.lt.s32.totalorder %v37_v17, 2 }
  0x1b   :  { %v40_v35 = vshrl.u32 %v315_v24, %v39_v23  ;;  %v42_v36 = vshrl.u32 %v316_v26, %v39_v23  ;;  %v45_v37 = vshrl.u32 %v317_v28, %v39_v23  ;;  %v48_v38 = vshrl.u32 %v318_v30, %v39_v23 }
  0x1c   :  { %v51_v39 = vshrl.u32 %v319_v32, %v39_v23  ;;  %v54_v41 = vshrl.u32 %v320_v40, %v39_v23  ;;  %vm59_vm4 = vcmp.lt.s32.totalorder %v37_v17, 4  ;;  %v143_v45 = vsub.s32 32, %v142_v21 }
  0x1d   :  { %v43_v42 = vor.u32 %v42_v36, %v41_v25  ;;  %v46_v43 = vor.u32 %v45_v37, %v44_v27  ;;  %v49_v44 = vor.u32 %v48_v38, %v47_v29  ;;  %vm58_vm5 = vcmp.lt.s32.totalorder %v37_v17, 3 }
  0x1e   :  { %v52_v46 = vor.u32 %v51_v39, %v50_v31  ;;  %v55_v47 = vor.u32 %v54_v41, %v53_v33  ;;  %v145_v48 = vshll.u32 %v315_v24, %v142_v21  ;;  %v148_v56 = vshll.u32 %v316_v26, %v142_v21 }
  0x1f   :  { %v60_v49 = vsel %vm56_vm2, %v40_v35, %v43_v42  ;;  %v61_v50 = vsel %vm59_vm4, %v49_v44, 2102212464  ;;  %v64_v51 = vsel %vm56_vm2, %v43_v42, %v46_v43  ;;  %v68_v52 = vsel %vm56_vm2, %v46_v43, %v49_v44 }
  0x20   :  { %v62_v53 = vsel %vm58_vm5, %v46_v43, %v61_v50  ;;  %v65_v54 = vsel %vm59_vm4, %v52_v46, 920167782  ;;  %v69_v55 = vsel %vm59_vm4, %v55_v47, 1326507024  ;;  %v144_v59 = vshrl.u32 %v315_v24, %v143_v45 }
  0x21   :  { %v66_v57 = vsel %vm58_vm5, %v49_v44, %v65_v54  ;;  %v70_v58 = vsel %vm58_vm5, %v52_v46, %v69_v55  ;;  %v146_v60 = vshrl.u32 %v316_v26, %v143_v45  ;;  %v63_v61 = vsel %vm57_vm3, %v60_v49, %v62_v53 }
  0x22   :  { %v67_v62 = vsel %vm57_vm3, %v64_v51, %v66_v57  ;;  %v71_v63 = vsel %vm57_vm3, %v68_v52, %v70_v58  ;;  %v149_v3 = vshrl.u32 %v317_v28, %v143_v45  ;;  %v151_v11 = vshll.u32 %v317_v28, %v142_v21 }
  0x23   :  { %v360_v5 = vmul.u32.u64.low %v347_v20, %v71_v63  ;;  %v361_v6 = vmul.u32.u64.high %v347_v20, %v71_v63, %v360_v5  ;;  %v364_v7 = vmul.u32.u64.low %v347_v20, %v67_v62  ;;  %v365_v8 = vmul.u32.u64.high %v347_v20, %v67_v62, %v364_v7 }
  0x24   :  { %v147_v9 = vor.u32 %v146_v60, %v145_v48  ;;  %v150_v10 = vor.u32 %v149_v3, %v148_v56  ;;  %v152_v12 = vshrl.u32 %v318_v30, %v143_v45  ;;  %v154_v13 = vshll.u32 %v318_v30, %v142_v21 }
  0x25   :  { %v155_v14 = vshrl.u32 %v319_v32, %v143_v45  ;;  %v157_v15 = vshll.u32 %v319_v32, %v142_v21  ;;  %v158_v16 = vshrl.u32 %v320_v40, %v143_v45  ;;  %v79_v17 = vmul.u32 %v347_v20, %v63_v61 }
  0x26   :  { %v153_v18 = vor.u32 %v152_v12, %v151_v11  ;;  %vm160_vm6 = vcmp.lt.s32.totalorder %v351_v34, 1  ;;  %vm161_vm7 = vcmp.lt.s32.totalorder %v351_v34, 2  ;;  %vm81_vm8 = vc.u32 %v361_v6, %v364_v7 }
  0x27   :  { %v82_v19 = vadd.s32 1, %v365_v8  ;;  %v156_v23 = vor.u32 %v155_v14, %v154_v13  ;;  %vm162_vm9 = vcmp.lt.s32.totalorder %v351_v34, 3  ;;  %v159_v24 = vor.u32 %v158_v16, %v157_v15 }
  0x28   :  { %vm163_vm10 = vcmp.lt.s32.totalorder %v351_v34, 4  ;;  %v164_v25 = vsel %vm160_vm6, %v144_v59, %v147_v9  ;;  %v168_v21 = vsel %vm160_vm6, %v147_v9, %v150_v10  ;;  %v172_v28 = vsel %vm160_vm6, %v150_v10, %v153_v18 }
  0x29   :  { %v83_v26 = vsel %vm81_vm8, %v82_v19, %v365_v8  ;;  %v165_v20 = vsel %vm163_vm10, %v153_v18, 2102212464  ;;  %v169_v27 = vsel %vm163_vm10, %v156_v23, 920167782  ;;  %v173_v32 = vsel %vm163_vm10, %v159_v24, 1326507024 }
  0x2a   :  { %v84_v29 = vadd.s32 %v83_v26, %v79_v17  ;;  %v166_v30 = vsel %vm162_vm9, %v150_v10, %v165_v20  ;;  %v170_v31 = vsel %vm162_vm9, %v153_v18, %v169_v27  ;;  %v174_v36 = vsel %vm162_vm9, %v156_v23, %v173_v32 }
  0x2b   :  { %v167_v33 = vsel %vm161_vm7, %v164_v25, %v166_v30  ;;  %v171_v35 = vsel %vm161_vm7, %v168_v21, %v170_v31  ;;  %v175_v38 = vsel %vm161_vm7, %v172_v28, %v174_v36  ;;  %v80_v57 = vadd.s32 %v364_v7, %v361_v6 }
  0x2c   :  { %v85_v37 = vadd.s32 536870912, %v84_v29  ;;  %v382_v39 = vmul.u32.u64.low %v349_v22, %v171_v35  ;;  %v383_v40 = vmul.u32.u64.high %v349_v22, %v171_v35, %v382_v39  ;;  %v183_v44 = vmul.u32 %v349_v22, %v167_v33 }
  0x2d   :  { %v386_v41 = vmul.u32.u64.low %v349_v22, %v175_v38  ;;  %v387_v42 = vmul.u32.u64.high %v349_v22, %v175_v38, %v386_v41  ;;  %vm116_vm6 = vweird.f32 %v335_v0  ;;  %vm220_vm9 = vweird.f32 %v337_v1 }
  0x2e   :  { %v86_v43 = vshrl.u32 %v85_v37, 30  ;;  %v186_v46 = vadd.s32 1, %v383_v40 }
  0x2f   :  { %vm185_vm11 = vc.u32 %v387_v42, %v382_v39  ;;  %v184_v13 = vadd.s32 %v382_v39, %v387_v42 }
  0x30   :  { %v87_v45 = vshll.u32 %v86_v43, 30  ;;  %v187_v34 = vsel %vm185_vm11, %v186_v46, %v383_v40  ;;  %v110_v20 = vsub.s32 4, %v86_v43 }
  0x31   :  { %v188_v48 = vadd.s32 %v187_v34, %v183_v44 }
  0x32   :  { %v88_v47 = vsub.s32 %v84_v29, %v87_v45  ;;  %v111_v31 = vsel %vm26_vm14, %v110_v20, %v86_v43 }
  0x33   :  { %v189_v50 = vadd.s32 536870912, %v188_v48  ;;  %v113_v35 = vsel %vm398_vm15, 0, %v111_v31 }
  0x34   :  { %v90_v49 = vsub.s32 0, %v88_v47  ;;  %v117_v39 = vadd.s32 3, %v113_v35 }
  0x35   :  { %v190_v52 = vshrl.u32 %v189_v50, 30 }
  0x36   :  { %v251_v51 = vmin.u32 %v90_v49, %v88_v47  ;;  %v118_v42 = vand.u32 3, %v117_v39 }
  0x37   :  { %v191_v54 = vshll.u32 %v190_v52, 30  ;;  %v214_v37 = vsub.s32 4, %v190_v52 }
  0x38   :  { %v92_v53 = vclz %v251_v51  ;;  %vm120_vm2 = vcmp.eq.s32.totalorder %v118_v42, 0  ;;  %vm123_vm3 = vcmp.eq.s32.totalorder %v118_v42, 2  ;;  %vm119_vm4 = vcmp.lt.s32.totalorder %v118_v42, 2 }
  0x39   :  { %v192_v56 = vsub.s32 %v188_v48, %v191_v54  ;;  %v215_v40 = vsel %vm130_vm0, %v214_v37, %v190_v52 }
  0x3a   :  { %v252_v55 = vadd.s32 4294967294, %v92_v53  ;;  %v217_v43 = vsel %vm408_vm1, 0, %v215_v40 }
  0x3b   :  { %v194_v58 = vsub.s32 0, %v192_v56  ;;  %v221_v46 = vand.u32 3, %v217_v43 }
  0x3c   :  { %vm253_vm12 = vcmp.lt.s32.totalorder %v252_v55, 0 }
  0x3d   :  { %v95_v22 = vsel %vm253_vm12, 0, %v252_v55  ;;  %v255_v62 = vmin.u32 %v194_v58, %v192_v56  ;;  %vm226_vm5 = vcmp.eq.s32.totalorder %v221_v46, 2  ;;  %vm223_vm7 = vcmp.eq.s32.totalorder %v221_v46, 0 }
  0x3e   :  { %v96_v59 = vsub.s32 32, %v95_v22  ;;  %v97_v60 = vshll.u32 %v88_v47, %v95_v22  ;;  %v100_v61 = vsub.s32 4294967266, %v95_v22  ;;  %vm222_vm8 = vcmp.lt.s32.totalorder %v221_v46, 2 }
  0x3f   :  { %v196_v5 = vclz %v255_v62 }
  0x40   :  { %v98_v63 = vshrl.u32 %v80_v57, %v96_v59  ;;  %v101_v3 = vadd.s32 127, %v100_v61 }
  0x41   :  { %v256_v10 = vadd.s32 4294967294, %v196_v5 }
  0x42   :  { %v99_v8 = vor.u32 %v98_v63, %v97_v60  ;;  %v102_v9 = vshll.u32 %v101_v3, 23 }
  0x43   :  { %vm257_vm13 = vcmp.lt.s32.totalorder %v256_v10, 0 }
  0x44   :  { %v103_v11 = vor.u32 4788187, %v102_v9  ;;  %v106_v12 = vcvt.s32.f32 %v99_v8  ;;  %v199_v6 = vsel %vm257_vm13, 0, %v256_v10 }
  0x45   :  { %v200_v7 = vsub.s32 32, %v199_v6  ;;  %v201_v15 = vshll.u32 %v192_v56, %v199_v6  ;;  %v204_v16 = vsub.s32 4294967266, %v199_v6 }
  0x46   :  { %v104_v14 = vand.u32 2147483647, %v103_v11 }
  0x47   :  { %v202_v18 = vshrl.u32 %v184_v13, %v200_v7  ;;  %v205_v19 = vadd.s32 127, %v204_v16 }
  0x48   :  { %v107_v17 = vmul.f32 %v106_v12, %v104_v14 }
  0x49   :  { %v203_v25 = vor.u32 %v202_v18, %v201_v15  ;;  %v206_v21 = vshll.u32 %v205_v19, 23 }
  0x4a   :  { %v108_v24 = vxor.u32 2147483648, %v107_v17 }
  0x4b   :  { %v207_v28 = vor.u32 4788187, %v206_v21  ;;  %v210_v29 = vcvt.s32.f32 %v203_v25 }
  0x4c   :  { %v109_v26 = vsel %vm26_vm14, %v108_v24, %v107_v17 }
  0x4d   :  { %v112_v27 = vsel %vm398_vm15, %v335_v0, %v109_v26  ;;  %v208_v30 = vand.u32 2147483647, %v207_v28 }
  0x4e   :  { %274 = vcosq.f32 %v112_v27 }
  0x4f   :  { %276 = vsinq.f32 %v112_v27  ;;  %v211_v32 = vmul.f32 %v210_v29, %v208_v30 }
  0x51   :  { %v212_v33 = vxor.u32 2147483648, %v211_v32 }
  0x53   :  { %v213_v36 = vsel %vm130_vm0, %v212_v33, %v211_v32 }
  0x54   :  { %v216_v38 = vsel %vm408_vm1, %v337_v1, %v213_v36 }
  0x55   :  { %278 = vcosq.f32 %v216_v38 }
  0x56   :  { %280 = vsinq.f32 %v216_v38 }
  0x5b   :  { %v275_v41 = vpop.eup %274 }
  0x5c   :  { %v277_v4 = vpop.eup %276  ;;  %v124_v45 = vxor.u32 2147483648, %v275_v41 }
  0x5d   :  { %v121_v44 = vxor.u32 2147483648, %v277_v4 }
  0x5e   :  { %v125_v34 = vsel %vm123_vm3, %v124_v45, %v277_v4 }
  0x5f   :  { %v122_v47 = vsel %vm120_vm2, %v275_v41, %v121_v44 }
  0x60   :  { %v126_v50 = vsel %vm119_vm4, %v122_v47, %v125_v34 }
  0x61   :  { %v127_v54 = vsel %vm116_vm6, nan, %v126_v50 }
  0x62   :  { %v279_v48 = vpop.eup %278 }
  0x63   :  { %v281_v49 = vpop.eup %280  ;;  %v227_v51 = vxor.u32 2147483648, %v279_v48 }
  0x64   :  { %v224_v52 = vxor.u32 2147483648, %v281_v49 }
  0x65   :  { %v228_v53 = vsel %vm226_vm5, %v227_v51, %v281_v49 }
  0x66   :  { %v225_v55 = vsel %vm223_vm7, %v279_v48, %v224_v52 }
  0x67   :  { %v229_v56 = vsel %vm222_vm8, %v225_v55, %v228_v53 }
  0x68   :  { %v230_v57 = vsel %vm220_vm9, nan, %v229_v56 }
  0x69   :  { %v231_v22 = vmul.f32 %v230_v57, %v127_v54 }
  0x6b   :  { %v232_v58 = vsub.f32 0.0, %v231_v22 }
  0x6d   :  { %233 = vst [vmem:[#allocation5] sm:$0x1] %v232_v58 }
  0x6e   :  { %301 = shalt.err (!%p298_p4)
}
  0x6f   :  { %243 = dma.vmem_to_hbm [thread:$0]  %s241_s11, 16, %s425_s1, [#allocation3]  }
  0x70   :  { %312 = dma.done.wait [#allocation3], 16  }
  0x71   :  { %313 = vsyncadd [#allocation3], 4294967280 }
  0x72   :  { %247 = vsyncpa [#allocation3], 1 }
  0x73   :  { %248 = vsyncpa [#allocation4], 1 }

</bundles_post_ra>
